<compile_context>
chip_gen: v6e
topology: v6e:2x2x1
jax: 0.10.0
libtpu: 0.0.40
codegen_flags: <defaults>
</compile_context>

<pallas_src>
import jax
import jax.numpy as jnp
from jax.experimental import pallas as pl
from jax.experimental.pallas import tpu as pltpu


def distance_head_kernel(x_ref, w_ref, b_ref, o_ref, xp_ref):
    # x_ref : (1, C, H, W)   VMEM  one batch element, NCHW (W -> lanes, H -> sublanes)
    # w_ref : (C*3*3,)       SMEM  conv weight, read as scalars (c*9 + ky*3 + kx)
    # b_ref : (1,)           SMEM  conv bias
    # o_ref : (1, 1, H, W)   VMEM
    # xp_ref: (C, H+2, W+2)  VMEM scratch — zero-padded copy of this batch element
    C, H, W = x_ref.shape[1], x_ref.shape[2], x_ref.shape[3]

    # Build the zero halo in VMEM (matches nn.Conv2d's default zero padding). Copy
    # channel by channel so only one (H, W) plane is ever live in vregs.
    xp_ref[...] = jnp.zeros_like(xp_ref)
    for c in range(C):
        xp_ref[c, 1:H + 1, 1:W + 1] = x_ref[0, c]

    # 3x3 conv = 9*C pure-VPU FMAs: per tap, a fresh (H, W) load at sublane offset dy /
    # lane offset dx from the padded scratch, scaled by a scalar SMEM weight.
    acc = jnp.zeros((H, W), jnp.float32)
    for c in range(C):  # TODO(synk): switch to lax.fori_loop over c if input_dim is large (e.g. 100)
        for dy in range(3):
            for dx in range(3):
                w = w_ref[c * 9 + dy * 3 + dx]
                acc = acc + xp_ref[c, dy:dy + H, dx:dx + W] * w

    o_ref[0, 0] = jax.nn.sigmoid(acc + b_ref[0])


def distance_head(x_nchw, weight, bias):
    """x_nchw: (N, C, H, W); weight: (1, C, 3, 3); bias: (1,).
    Returns (N, 1, H, W) f32 == Sigmoid(Conv2d(C, 1, 3, padding=1)(x)), as in DistanceHead."""
    N, C, H, W = x_nchw.shape

    x = x_nchw.astype(jnp.float32)                    # no transpose / pad: zero wrapper HBM glue
    w_flat = weight.astype(jnp.float32).reshape(-1)   # (C*9,), row-major == [c, ky, kx]
    b = bias.astype(jnp.float32)                      # (1,)

    return pl.pallas_call(
        distance_head_kernel,
        out_shape=jax.ShapeDtypeStruct((N, 1, H, W), jnp.float32),
        grid=(N,),  # >=2 parallel grid steps keeps both v7x TensorCores busy
        in_specs=[
            pl.BlockSpec((1, C, H, W), lambda n: (n, 0, 0, 0)),
            pl.BlockSpec(memory_space=pltpu.MemorySpace.SMEM),
            pl.BlockSpec(memory_space=pltpu.MemorySpace.SMEM),
        ],
        out_specs=pl.BlockSpec((1, 1, H, W), lambda n: (n, 0, 0, 0)),
        scratch_shapes=[pltpu.VMEM((C, H + 2, W + 2), jnp.float32)],
        compiler_params=pltpu.CompilerParams(dimension_semantics=("parallel",)),
    )(x, w_flat, b)


if __name__ == "__main__":
    # Small shapes consistent with the module: batch=2, channels=4, spatial=16.
    N, C, H, W = 2, 4, 16, 16

    key = jax.random.PRNGKey(0)
    kx, kw, kb = jax.random.split(key, 3)
    x = jax.random.normal(kx, (N, C, H, W), dtype=jnp.float32)
    # Conv2d(C, 1, 3) parameter shapes: weight (1, C, 3, 3), bias (1,).
    weight = jax.random.normal(kw, (1, C, 3, 3), dtype=jnp.float32) * 0.1
    bias = jax.random.normal(kb, (1,), dtype=jnp.float32) * 0.1

    out = distance_head(x, weight, bias)
    out = jax.block_until_ready(out)

    # Reference: same semantics as the PyTorch module.
    ref = jax.lax.conv_general_dilated(
        x, weight, window_strides=(1, 1), padding="SAME",
        dimension_numbers=("NCHW", "OIHW", "NCHW"),
    ) + bias.reshape(1, 1, 1, 1)
    ref = jax.nn.sigmoid(ref)

    assert out.shape == (N, 1, H, W)
    assert jnp.allclose(out, ref, atol=1e-5, rtol=1e-5)
    print("KERNEL_OK")
</pallas_src>

<mosaic_0001>
module attributes {stable_mosaic.version = 11 : i64} {
  func.func @distance_head_kernel(%arg0: i32, %arg1: memref<1x4x16x16xf32, #tpu.memory_space<vmem>>, %arg2: memref<36xf32, #tpu.memory_space<smem>>, %arg3: memref<1xf32, #tpu.memory_space<smem>>, %arg4: memref<1x1x16x16xf32, #tpu.memory_space<vmem>>, %arg5: memref<4x18x18xf32, #tpu.memory_space<vmem>>) attributes {dimension_semantics = [#tpu.dimension_semantics<parallel>], iteration_bounds = array<i64: 2>, scalar_prefetch = 0 : i64, scratch_operands = 1 : i64, tpu.core_type = #tpu.core_type<tc>, window_params = [{transform_indices = @transform_0, window_bounds = array<i64: 1, 4, 16, 16>}, {transform_indices = @transform_1, window_bounds = array<i64: 36>}, {transform_indices = @transform_2, window_bounds = array<i64: 1>}, {transform_indices = @transform_3, window_bounds = array<i64: 1, 1, 16, 16>}]} {
    %cst = arith.constant 0.000000e+00 : f32
    %0 = vector.broadcast %cst : f32 to vector<4x18x18xf32>
    %c0 = arith.constant 0 : index
    %c0_0 = arith.constant 0 : index
    %c0_1 = arith.constant 0 : index
    %1 = vector.load %arg5[%c0, %c0_0, %c0_1] : memref<4x18x18xf32, #tpu.memory_space<vmem>>, vector<4x18x18xf32>
    tpu.vector_store %arg5[%c0, %c0_0, %c0_1], %0 {strides = array<i32>} : memref<4x18x18xf32, #tpu.memory_space<vmem>>, vector<4x18x18xf32>,
    %c0_2 = arith.constant 0 : index
    %c0_3 = arith.constant 0 : index
    %c0_4 = arith.constant 0 : index
    %c0_5 = arith.constant 0 : index
    %2 = vector.load %arg1[%c0_2, %c0_3, %c0_4, %c0_5] : memref<1x4x16x16xf32, #tpu.memory_space<vmem>>, vector<1x1x16x16xf32>
    %3 = vector.shape_cast %2 : vector<1x1x16x16xf32> to vector<16x16xf32>
    %c0_6 = arith.constant 0 : index
    %c1 = arith.constant 1 : index
    %c1_7 = arith.constant 1 : index
    %4 = vector.load %arg5[%c0_6, %c1, %c1_7] : memref<4x18x18xf32, #tpu.memory_space<vmem>>, vector<1x16x16xf32>
    %5 = vector.shape_cast %4 : vector<1x16x16xf32> to vector<16x16xf32>
    %6 = vector.shape_cast %3 : vector<16x16xf32> to vector<1x16x16xf32>
    tpu.vector_store %arg5[%c0_6, %c1, %c1_7], %6 {strides = array<i32>} : memref<4x18x18xf32, #tpu.memory_space<vmem>>, vector<1x16x16xf32>,
    %c0_8 = arith.constant 0 : index
    %c1_9 = arith.constant 1 : index
    %c0_10 = arith.constant 0 : index
    %c0_11 = arith.constant 0 : index
    %7 = vector.load %arg1[%c0_8, %c1_9, %c0_10, %c0_11] : memref<1x4x16x16xf32, #tpu.memory_space<vmem>>, vector<1x1x16x16xf32>
    %8 = vector.shape_cast %7 : vector<1x1x16x16xf32> to vector<16x16xf32>
    %c1_12 = arith.constant 1 : index
    %c1_13 = arith.constant 1 : index
    %c1_14 = arith.constant 1 : index
    %9 = vector.load %arg5[%c1_12, %c1_13, %c1_14] : memref<4x18x18xf32, #tpu.memory_space<vmem>>, vector<1x16x16xf32>
    %10 = vector.shape_cast %9 : vector<1x16x16xf32> to vector<16x16xf32>
    %11 = vector.shape_cast %8 : vector<16x16xf32> to vector<1x16x16xf32>
    tpu.vector_store %arg5[%c1_12, %c1_13, %c1_14], %11 {strides = array<i32>} : memref<4x18x18xf32, #tpu.memory_space<vmem>>, vector<1x16x16xf32>,
    %c0_15 = arith.constant 0 : index
    %c2 = arith.constant 2 : index
    %c0_16 = arith.constant 0 : index
    %c0_17 = arith.constant 0 : index
    %12 = vector.load %arg1[%c0_15, %c2, %c0_16, %c0_17] : memref<1x4x16x16xf32, #tpu.memory_space<vmem>>, vector<1x1x16x16xf32>
    %13 = vector.shape_cast %12 : vector<1x1x16x16xf32> to vector<16x16xf32>
    %c2_18 = arith.constant 2 : index
    %c1_19 = arith.constant 1 : index
    %c1_20 = arith.constant 1 : index
    %14 = vector.load %arg5[%c2_18, %c1_19, %c1_20] : memref<4x18x18xf32, #tpu.memory_space<vmem>>, vector<1x16x16xf32>
    %15 = vector.shape_cast %14 : vector<1x16x16xf32> to vector<16x16xf32>
    %16 = vector.shape_cast %13 : vector<16x16xf32> to vector<1x16x16xf32>
    tpu.vector_store %arg5[%c2_18, %c1_19, %c1_20], %16 {strides = array<i32>} : memref<4x18x18xf32, #tpu.memory_space<vmem>>, vector<1x16x16xf32>,
    %c0_21 = arith.constant 0 : index
    %c3 = arith.constant 3 : index
    %c0_22 = arith.constant 0 : index
    %c0_23 = arith.constant 0 : index
    %17 = vector.load %arg1[%c0_21, %c3, %c0_22, %c0_23] : memref<1x4x16x16xf32, #tpu.memory_space<vmem>>, vector<1x1x16x16xf32>
    %18 = vector.shape_cast %17 : vector<1x1x16x16xf32> to vector<16x16xf32>
    %c3_24 = arith.constant 3 : index
    %c1_25 = arith.constant 1 : index
    %c1_26 = arith.constant 1 : index
    %19 = vector.load %arg5[%c3_24, %c1_25, %c1_26] : memref<4x18x18xf32, #tpu.memory_space<vmem>>, vector<1x16x16xf32>
    %20 = vector.shape_cast %19 : vector<1x16x16xf32> to vector<16x16xf32>
    %21 = vector.shape_cast %18 : vector<16x16xf32> to vector<1x16x16xf32>
    tpu.vector_store %arg5[%c3_24, %c1_25, %c1_26], %21 {strides = array<i32>} : memref<4x18x18xf32, #tpu.memory_space<vmem>>, vector<1x16x16xf32>,
    %cst_27 = arith.constant 0.000000e+00 : f32
    %22 = vector.broadcast %cst_27 : f32 to vector<16x16xf32>
    %c0_28 = arith.constant 0 : index
    %23 = memref.load %arg2[%c0_28] : memref<36xf32, #tpu.memory_space<smem>>
    %c0_29 = arith.constant 0 : index
    %c0_30 = arith.constant 0 : index
    %c0_31 = arith.constant 0 : index
    %24 = vector.load %arg5[%c0_29, %c0_30, %c0_31] : memref<4x18x18xf32, #tpu.memory_space<vmem>>, vector<1x16x16xf32>
    %25 = vector.shape_cast %24 : vector<1x16x16xf32> to vector<16x16xf32>
    %26 = vector.broadcast %23 : f32 to vector<16x16xf32>
    %27 = arith.mulf %25, %26 : vector<16x16xf32>
    %28 = arith.addf %22, %27 : vector<16x16xf32>
    %c1_32 = arith.constant 1 : index
    %29 = memref.load %arg2[%c1_32] : memref<36xf32, #tpu.memory_space<smem>>
    %c0_33 = arith.constant 0 : index
    %c0_34 = arith.constant 0 : index
    %c1_35 = arith.constant 1 : index
    %30 = vector.load %arg5[%c0_33, %c0_34, %c1_35] : memref<4x18x18xf32, #tpu.memory_space<vmem>>, vector<1x16x16xf32>
    %31 = vector.shape_cast %30 : vector<1x16x16xf32> to vector<16x16xf32>
    %32 = vector.broadcast %29 : f32 to vector<16x16xf32>
    %33 = arith.mulf %31, %32 : vector<16x16xf32>
    %34 = arith.addf %28, %33 : vector<16x16xf32>
    %c2_36 = arith.constant 2 : index
    %35 = memref.load %arg2[%c2_36] : memref<36xf32, #tpu.memory_space<smem>>
    %c0_37 = arith.constant 0 : index
    %c0_38 = arith.constant 0 : index
    %c2_39 = arith.constant 2 : index
    %36 = vector.load %arg5[%c0_37, %c0_38, %c2_39] : memref<4x18x18xf32, #tpu.memory_space<vmem>>, vector<1x16x16xf32>
    %37 = vector.shape_cast %36 : vector<1x16x16xf32> to vector<16x16xf32>
    %38 = vector.broadcast %35 : f32 to vector<16x16xf32>
    %39 = arith.mulf %37, %38 : vector<16x16xf32>
    %40 = arith.addf %34, %39 : vector<16x16xf32>
    %c3_40 = arith.constant 3 : index
    %41 = memref.load %arg2[%c3_40] : memref<36xf32, #tpu.memory_space<smem>>
    %c0_41 = arith.constant 0 : index
    %c1_42 = arith.constant 1 : index
    %c0_43 = arith.constant 0 : index
    %42 = vector.load %arg5[%c0_41, %c1_42, %c0_43] : memref<4x18x18xf32, #tpu.memory_space<vmem>>, vector<1x16x16xf32>
    %43 = vector.shape_cast %42 : vector<1x16x16xf32> to vector<16x16xf32>
    %44 = vector.broadcast %41 : f32 to vector<16x16xf32>
    %45 = arith.mulf %43, %44 : vector<16x16xf32>
    %46 = arith.addf %40, %45 : vector<16x16xf32>
    %c4 = arith.constant 4 : index
    %47 = memref.load %arg2[%c4] : memref<36xf32, #tpu.memory_space<smem>>
    %c0_44 = arith.constant 0 : index
    %c1_45 = arith.constant 1 : index
    %c1_46 = arith.constant 1 : index
    %48 = vector.load %arg5[%c0_44, %c1_45, %c1_46] : memref<4x18x18xf32, #tpu.memory_space<vmem>>, vector<1x16x16xf32>
    %49 = vector.shape_cast %48 : vector<1x16x16xf32> to vector<16x16xf32>
    %50 = vector.broadcast %47 : f32 to vector<16x16xf32>
    %51 = arith.mulf %49, %50 : vector<16x16xf32>
    %52 = arith.addf %46, %51 : vector<16x16xf32>
    %c5 = arith.constant 5 : index
    %53 = memref.load %arg2[%c5] : memref<36xf32, #tpu.memory_space<smem>>
    %c0_47 = arith.constant 0 : index
    %c1_48 = arith.constant 1 : index
    %c2_49 = arith.constant 2 : index
    %54 = vector.load %arg5[%c0_47, %c1_48, %c2_49] : memref<4x18x18xf32, #tpu.memory_space<vmem>>, vector<1x16x16xf32>
    %55 = vector.shape_cast %54 : vector<1x16x16xf32> to vector<16x16xf32>
    %56 = vector.broadcast %53 : f32 to vector<16x16xf32>
    %57 = arith.mulf %55, %56 : vector<16x16xf32>
    %58 = arith.addf %52, %57 : vector<16x16xf32>
    %c6 = arith.constant 6 : index
    %59 = memref.load %arg2[%c6] : memref<36xf32, #tpu.memory_space<smem>>
    %c0_50 = arith.constant 0 : index
    %c2_51 = arith.constant 2 : index
    %c0_52 = arith.constant 0 : index
    %60 = vector.load %arg5[%c0_50, %c2_51, %c0_52] : memref<4x18x18xf32, #tpu.memory_space<vmem>>, vector<1x16x16xf32>
    %61 = vector.shape_cast %60 : vector<1x16x16xf32> to vector<16x16xf32>
    %62 = vector.broadcast %59 : f32 to vector<16x16xf32>
    %63 = arith.mulf %61, %62 : vector<16x16xf32>
    %64 = arith.addf %58, %63 : vector<16x16xf32>
    %c7 = arith.constant 7 : index
    %65 = memref.load %arg2[%c7] : memref<36xf32, #tpu.memory_space<smem>>
    %c0_53 = arith.constant 0 : index
    %c2_54 = arith.constant 2 : index
    %c1_55 = arith.constant 1 : index
    %66 = vector.load %arg5[%c0_53, %c2_54, %c1_55] : memref<4x18x18xf32, #tpu.memory_space<vmem>>, vector<1x16x16xf32>
    %67 = vector.shape_cast %66 : vector<1x16x16xf32> to vector<16x16xf32>
    %68 = vector.broadcast %65 : f32 to vector<16x16xf32>
    %69 = arith.mulf %67, %68 : vector<16x16xf32>
    %70 = arith.addf %64, %69 : vector<16x16xf32>
    %c8 = arith.constant 8 : index
    %71 = memref.load %arg2[%c8] : memref<36xf32, #tpu.memory_space<smem>>
    %c0_56 = arith.constant 0 : index
    %c2_57 = arith.constant 2 : index
    %c2_58 = arith.constant 2 : index
    %72 = vector.load %arg5[%c0_56, %c2_57, %c2_58] : memref<4x18x18xf32, #tpu.memory_space<vmem>>, vector<1x16x16xf32>
    %73 = vector.shape_cast %72 : vector<1x16x16xf32> to vector<16x16xf32>
    %74 = vector.broadcast %71 : f32 to vector<16x16xf32>
    %75 = arith.mulf %73, %74 : vector<16x16xf32>
    %76 = arith.addf %70, %75 : vector<16x16xf32>
    %c9 = arith.constant 9 : index
    %77 = memref.load %arg2[%c9] : memref<36xf32, #tpu.memory_space<smem>>
    %c1_59 = arith.constant 1 : index
    %c0_60 = arith.constant 0 : index
    %c0_61 = arith.constant 0 : index
    %78 = vector.load %arg5[%c1_59, %c0_60, %c0_61] : memref<4x18x18xf32, #tpu.memory_space<vmem>>, vector<1x16x16xf32>
    %79 = vector.shape_cast %78 : vector<1x16x16xf32> to vector<16x16xf32>
    %80 = vector.broadcast %77 : f32 to vector<16x16xf32>
    %81 = arith.mulf %79, %80 : vector<16x16xf32>
    %82 = arith.addf %76, %81 : vector<16x16xf32>
    %c10 = arith.constant 10 : index
    %83 = memref.load %arg2[%c10] : memref<36xf32, #tpu.memory_space<smem>>
    %c1_62 = arith.constant 1 : index
    %c0_63 = arith.constant 0 : index
    %c1_64 = arith.constant 1 : index
    %84 = vector.load %arg5[%c1_62, %c0_63, %c1_64] : memref<4x18x18xf32, #tpu.memory_space<vmem>>, vector<1x16x16xf32>
    %85 = vector.shape_cast %84 : vector<1x16x16xf32> to vector<16x16xf32>
    %86 = vector.broadcast %83 : f32 to vector<16x16xf32>
    %87 = arith.mulf %85, %86 : vector<16x16xf32>
    %88 = arith.addf %82, %87 : vector<16x16xf32>
    %c11 = arith.constant 11 : index
    %89 = memref.load %arg2[%c11] : memref<36xf32, #tpu.memory_space<smem>>
    %c1_65 = arith.constant 1 : index
    %c0_66 = arith.constant 0 : index
    %c2_67 = arith.constant 2 : index
    %90 = vector.load %arg5[%c1_65, %c0_66, %c2_67] : memref<4x18x18xf32, #tpu.memory_space<vmem>>, vector<1x16x16xf32>
    %91 = vector.shape_cast %90 : vector<1x16x16xf32> to vector<16x16xf32>
    %92 = vector.broadcast %89 : f32 to vector<16x16xf32>
    %93 = arith.mulf %91, %92 : vector<16x16xf32>
    %94 = arith.addf %88, %93 : vector<16x16xf32>
    %c12 = arith.constant 12 : index
    %95 = memref.load %arg2[%c12] : memref<36xf32, #tpu.memory_space<smem>>
    %c1_68 = arith.constant 1 : index
    %c1_69 = arith.constant 1 : index
    %c0_70 = arith.constant 0 : index
    %96 = vector.load %arg5[%c1_68, %c1_69, %c0_70] : memref<4x18x18xf32, #tpu.memory_space<vmem>>, vector<1x16x16xf32>
    %97 = vector.shape_cast %96 : vector<1x16x16xf32> to vector<16x16xf32>
    %98 = vector.broadcast %95 : f32 to vector<16x16xf32>
    %99 = arith.mulf %97, %98 : vector<16x16xf32>
    %100 = arith.addf %94, %99 : vector<16x16xf32>
    %c13 = arith.constant 13 : index
    %101 = memref.load %arg2[%c13] : memref<36xf32, #tpu.memory_space<smem>>
    %c1_71 = arith.constant 1 : index
    %c1_72 = arith.constant 1 : index
    %c1_73 = arith.constant 1 : index
    %102 = vector.load %arg5[%c1_71, %c1_72, %c1_73] : memref<4x18x18xf32, #tpu.memory_space<vmem>>, vector<1x16x16xf32>
    %103 = vector.shape_cast %102 : vector<1x16x16xf32> to vector<16x16xf32>
    %104 = vector.broadcast %101 : f32 to vector<16x16xf32>
    %105 = arith.mulf %103, %104 : vector<16x16xf32>
    %106 = arith.addf %100, %105 : vector<16x16xf32>
    %c14 = arith.constant 14 : index
    %107 = memref.load %arg2[%c14] : memref<36xf32, #tpu.memory_space<smem>>
    %c1_74 = arith.constant 1 : index
    %c1_75 = arith.constant 1 : index
    %c2_76 = arith.constant 2 : index
    %108 = vector.load %arg5[%c1_74, %c1_75, %c2_76] : memref<4x18x18xf32, #tpu.memory_space<vmem>>, vector<1x16x16xf32>
    %109 = vector.shape_cast %108 : vector<1x16x16xf32> to vector<16x16xf32>
    %110 = vector.broadcast %107 : f32 to vector<16x16xf32>
    %111 = arith.mulf %109, %110 : vector<16x16xf32>
    %112 = arith.addf %106, %111 : vector<16x16xf32>
    %c15 = arith.constant 15 : index
    %113 = memref.load %arg2[%c15] : memref<36xf32, #tpu.memory_space<smem>>
    %c1_77 = arith.constant 1 : index
    %c2_78 = arith.constant 2 : index
    %c0_79 = arith.constant 0 : index
    %114 = vector.load %arg5[%c1_77, %c2_78, %c0_79] : memref<4x18x18xf32, #tpu.memory_space<vmem>>, vector<1x16x16xf32>
    %115 = vector.shape_cast %114 : vector<1x16x16xf32> to vector<16x16xf32>
    %116 = vector.broadcast %113 : f32 to vector<16x16xf32>
    %117 = arith.mulf %115, %116 : vector<16x16xf32>
    %118 = arith.addf %112, %117 : vector<16x16xf32>
    %c16 = arith.constant 16 : index
    %119 = memref.load %arg2[%c16] : memref<36xf32, #tpu.memory_space<smem>>
    %c1_80 = arith.constant 1 : index
    %c2_81 = arith.constant 2 : index
    %c1_82 = arith.constant 1 : index
    %120 = vector.load %arg5[%c1_80, %c2_81, %c1_82] : memref<4x18x18xf32, #tpu.memory_space<vmem>>, vector<1x16x16xf32>
    %121 = vector.shape_cast %120 : vector<1x16x16xf32> to vector<16x16xf32>
    %122 = vector.broadcast %119 : f32 to vector<16x16xf32>
    %123 = arith.mulf %121, %122 : vector<16x16xf32>
    %124 = arith.addf %118, %123 : vector<16x16xf32>
    %c17 = arith.constant 17 : index
    %125 = memref.load %arg2[%c17] : memref<36xf32, #tpu.memory_space<smem>>
    %c1_83 = arith.constant 1 : index
    %c2_84 = arith.constant 2 : index
    %c2_85 = arith.constant 2 : index
    %126 = vector.load %arg5[%c1_83, %c2_84, %c2_85] : memref<4x18x18xf32, #tpu.memory_space<vmem>>, vector<1x16x16xf32>
    %127 = vector.shape_cast %126 : vector<1x16x16xf32> to vector<16x16xf32>
    %128 = vector.broadcast %125 : f32 to vector<16x16xf32>
    %129 = arith.mulf %127, %128 : vector<16x16xf32>
    %130 = arith.addf %124, %129 : vector<16x16xf32>
    %c18 = arith.constant 18 : index
    %131 = memref.load %arg2[%c18] : memref<36xf32, #tpu.memory_space<smem>>
    %c2_86 = arith.constant 2 : index
    %c0_87 = arith.constant 0 : index
    %c0_88 = arith.constant 0 : index
    %132 = vector.load %arg5[%c2_86, %c0_87, %c0_88] : memref<4x18x18xf32, #tpu.memory_space<vmem>>, vector<1x16x16xf32>
    %133 = vector.shape_cast %132 : vector<1x16x16xf32> to vector<16x16xf32>
    %134 = vector.broadcast %131 : f32 to vector<16x16xf32>
    %135 = arith.mulf %133, %134 : vector<16x16xf32>
    %136 = arith.addf %130, %135 : vector<16x16xf32>
    %c19 = arith.constant 19 : index
    %137 = memref.load %arg2[%c19] : memref<36xf32, #tpu.memory_space<smem>>
    %c2_89 = arith.constant 2 : index
    %c0_90 = arith.constant 0 : index
    %c1_91 = arith.constant 1 : index
    %138 = vector.load %arg5[%c2_89, %c0_90, %c1_91] : memref<4x18x18xf32, #tpu.memory_space<vmem>>, vector<1x16x16xf32>
    %139 = vector.shape_cast %138 : vector<1x16x16xf32> to vector<16x16xf32>
    %140 = vector.broadcast %137 : f32 to vector<16x16xf32>
    %141 = arith.mulf %139, %140 : vector<16x16xf32>
    %142 = arith.addf %136, %141 : vector<16x16xf32>
    %c20 = arith.constant 20 : index
    %143 = memref.load %arg2[%c20] : memref<36xf32, #tpu.memory_space<smem>>
    %c2_92 = arith.constant 2 : index
    %c0_93 = arith.constant 0 : index
    %c2_94 = arith.constant 2 : index
    %144 = vector.load %arg5[%c2_92, %c0_93, %c2_94] : memref<4x18x18xf32, #tpu.memory_space<vmem>>, vector<1x16x16xf32>
    %145 = vector.shape_cast %144 : vector<1x16x16xf32> to vector<16x16xf32>
    %146 = vector.broadcast %143 : f32 to vector<16x16xf32>
    %147 = arith.mulf %145, %146 : vector<16x16xf32>
    %148 = arith.addf %142, %147 : vector<16x16xf32>
    %c21 = arith.constant 21 : index
    %149 = memref.load %arg2[%c21] : memref<36xf32, #tpu.memory_space<smem>>
    %c2_95 = arith.constant 2 : index
    %c1_96 = arith.constant 1 : index
    %c0_97 = arith.constant 0 : index
    %150 = vector.load %arg5[%c2_95, %c1_96, %c0_97] : memref<4x18x18xf32, #tpu.memory_space<vmem>>, vector<1x16x16xf32>
    %151 = vector.shape_cast %150 : vector<1x16x16xf32> to vector<16x16xf32>
    %152 = vector.broadcast %149 : f32 to vector<16x16xf32>
    %153 = arith.mulf %151, %152 : vector<16x16xf32>
    %154 = arith.addf %148, %153 : vector<16x16xf32>
    %c22 = arith.constant 22 : index
    %155 = memref.load %arg2[%c22] : memref<36xf32, #tpu.memory_space<smem>>
    %c2_98 = arith.constant 2 : index
    %c1_99 = arith.constant 1 : index
    %c1_100 = arith.constant 1 : index
    %156 = vector.load %arg5[%c2_98, %c1_99, %c1_100] : memref<4x18x18xf32, #tpu.memory_space<vmem>>, vector<1x16x16xf32>
    %157 = vector.shape_cast %156 : vector<1x16x16xf32> to vector<16x16xf32>
    %158 = vector.broadcast %155 : f32 to vector<16x16xf32>
    %159 = arith.mulf %157, %158 : vector<16x16xf32>
    %160 = arith.addf %154, %159 : vector<16x16xf32>
    %c23 = arith.constant 23 : index
    %161 = memref.load %arg2[%c23] : memref<36xf32, #tpu.memory_space<smem>>
    %c2_101 = arith.constant 2 : index
    %c1_102 = arith.constant 1 : index
    %c2_103 = arith.constant 2 : index
    %162 = vector.load %arg5[%c2_101, %c1_102, %c2_103] : memref<4x18x18xf32, #tpu.memory_space<vmem>>, vector<1x16x16xf32>
    %163 = vector.shape_cast %162 : vector<1x16x16xf32> to vector<16x16xf32>
    %164 = vector.broadcast %161 : f32 to vector<16x16xf32>
    %165 = arith.mulf %163, %164 : vector<16x16xf32>
    %166 = arith.addf %160, %165 : vector<16x16xf32>
    %c24 = arith.constant 24 : index
    %167 = memref.load %arg2[%c24] : memref<36xf32, #tpu.memory_space<smem>>
    %c2_104 = arith.constant 2 : index
    %c2_105 = arith.constant 2 : index
    %c0_106 = arith.constant 0 : index
    %168 = vector.load %arg5[%c2_104, %c2_105, %c0_106] : memref<4x18x18xf32, #tpu.memory_space<vmem>>, vector<1x16x16xf32>
    %169 = vector.shape_cast %168 : vector<1x16x16xf32> to vector<16x16xf32>
    %170 = vector.broadcast %167 : f32 to vector<16x16xf32>
    %171 = arith.mulf %169, %170 : vector<16x16xf32>
    %172 = arith.addf %166, %171 : vector<16x16xf32>
    %c25 = arith.constant 25 : index
    %173 = memref.load %arg2[%c25] : memref<36xf32, #tpu.memory_space<smem>>
    %c2_107 = arith.constant 2 : index
    %c2_108 = arith.constant 2 : index
    %c1_109 = arith.constant 1 : index
    %174 = vector.load %arg5[%c2_107, %c2_108, %c1_109] : memref<4x18x18xf32, #tpu.memory_space<vmem>>, vector<1x16x16xf32>
    %175 = vector.shape_cast %174 : vector<1x16x16xf32> to vector<16x16xf32>
    %176 = vector.broadcast %173 : f32 to vector<16x16xf32>
    %177 = arith.mulf %175, %176 : vector<16x16xf32>
    %178 = arith.addf %172, %177 : vector<16x16xf32>
    %c26 = arith.constant 26 : index
    %179 = memref.load %arg2[%c26] : memref<36xf32, #tpu.memory_space<smem>>
    %c2_110 = arith.constant 2 : index
    %c2_111 = arith.constant 2 : index
    %c2_112 = arith.constant 2 : index
    %180 = vector.load %arg5[%c2_110, %c2_111, %c2_112] : memref<4x18x18xf32, #tpu.memory_space<vmem>>, vector<1x16x16xf32>
    %181 = vector.shape_cast %180 : vector<1x16x16xf32> to vector<16x16xf32>
    %182 = vector.broadcast %179 : f32 to vector<16x16xf32>
    %183 = arith.mulf %181, %182 : vector<16x16xf32>
    %184 = arith.addf %178, %183 : vector<16x16xf32>
    %c27 = arith.constant 27 : index
    %185 = memref.load %arg2[%c27] : memref<36xf32, #tpu.memory_space<smem>>
    %c3_113 = arith.constant 3 : index
    %c0_114 = arith.constant 0 : index
    %c0_115 = arith.constant 0 : index
    %186 = vector.load %arg5[%c3_113, %c0_114, %c0_115] : memref<4x18x18xf32, #tpu.memory_space<vmem>>, vector<1x16x16xf32>
    %187 = vector.shape_cast %186 : vector<1x16x16xf32> to vector<16x16xf32>
    %188 = vector.broadcast %185 : f32 to vector<16x16xf32>
    %189 = arith.mulf %187, %188 : vector<16x16xf32>
    %190 = arith.addf %184, %189 : vector<16x16xf32>
    %c28 = arith.constant 28 : index
    %191 = memref.load %arg2[%c28] : memref<36xf32, #tpu.memory_space<smem>>
    %c3_116 = arith.constant 3 : index
    %c0_117 = arith.constant 0 : index
    %c1_118 = arith.constant 1 : index
    %192 = vector.load %arg5[%c3_116, %c0_117, %c1_118] : memref<4x18x18xf32, #tpu.memory_space<vmem>>, vector<1x16x16xf32>
    %193 = vector.shape_cast %192 : vector<1x16x16xf32> to vector<16x16xf32>
    %194 = vector.broadcast %191 : f32 to vector<16x16xf32>
    %195 = arith.mulf %193, %194 : vector<16x16xf32>
    %196 = arith.addf %190, %195 : vector<16x16xf32>
    %c29 = arith.constant 29 : index
    %197 = memref.load %arg2[%c29] : memref<36xf32, #tpu.memory_space<smem>>
    %c3_119 = arith.constant 3 : index
    %c0_120 = arith.constant 0 : index
    %c2_121 = arith.constant 2 : index
    %198 = vector.load %arg5[%c3_119, %c0_120, %c2_121] : memref<4x18x18xf32, #tpu.memory_space<vmem>>, vector<1x16x16xf32>
    %199 = vector.shape_cast %198 : vector<1x16x16xf32> to vector<16x16xf32>
    %200 = vector.broadcast %197 : f32 to vector<16x16xf32>
    %201 = arith.mulf %199, %200 : vector<16x16xf32>
    %202 = arith.addf %196, %201 : vector<16x16xf32>
    %c30 = arith.constant 30 : index
    %203 = memref.load %arg2[%c30] : memref<36xf32, #tpu.memory_space<smem>>
    %c3_122 = arith.constant 3 : index
    %c1_123 = arith.constant 1 : index
    %c0_124 = arith.constant 0 : index
    %204 = vector.load %arg5[%c3_122, %c1_123, %c0_124] : memref<4x18x18xf32, #tpu.memory_space<vmem>>, vector<1x16x16xf32>
    %205 = vector.shape_cast %204 : vector<1x16x16xf32> to vector<16x16xf32>
    %206 = vector.broadcast %203 : f32 to vector<16x16xf32>
    %207 = arith.mulf %205, %206 : vector<16x16xf32>
    %208 = arith.addf %202, %207 : vector<16x16xf32>
    %c31 = arith.constant 31 : index
    %209 = memref.load %arg2[%c31] : memref<36xf32, #tpu.memory_space<smem>>
    %c3_125 = arith.constant 3 : index
    %c1_126 = arith.constant 1 : index
    %c1_127 = arith.constant 1 : index
    %210 = vector.load %arg5[%c3_125, %c1_126, %c1_127] : memref<4x18x18xf32, #tpu.memory_space<vmem>>, vector<1x16x16xf32>
    %211 = vector.shape_cast %210 : vector<1x16x16xf32> to vector<16x16xf32>
    %212 = vector.broadcast %209 : f32 to vector<16x16xf32>
    %213 = arith.mulf %211, %212 : vector<16x16xf32>
    %214 = arith.addf %208, %213 : vector<16x16xf32>
    %c32 = arith.constant 32 : index
    %215 = memref.load %arg2[%c32] : memref<36xf32, #tpu.memory_space<smem>>
    %c3_128 = arith.constant 3 : index
    %c1_129 = arith.constant 1 : index
    %c2_130 = arith.constant 2 : index
    %216 = vector.load %arg5[%c3_128, %c1_129, %c2_130] : memref<4x18x18xf32, #tpu.memory_space<vmem>>, vector<1x16x16xf32>
    %217 = vector.shape_cast %216 : vector<1x16x16xf32> to vector<16x16xf32>
    %218 = vector.broadcast %215 : f32 to vector<16x16xf32>
    %219 = arith.mulf %217, %218 : vector<16x16xf32>
    %220 = arith.addf %214, %219 : vector<16x16xf32>
    %c33 = arith.constant 33 : index
    %221 = memref.load %arg2[%c33] : memref<36xf32, #tpu.memory_space<smem>>
    %c3_131 = arith.constant 3 : index
    %c2_132 = arith.constant 2 : index
    %c0_133 = arith.constant 0 : index
    %222 = vector.load %arg5[%c3_131, %c2_132, %c0_133] : memref<4x18x18xf32, #tpu.memory_space<vmem>>, vector<1x16x16xf32>
    %223 = vector.shape_cast %222 : vector<1x16x16xf32> to vector<16x16xf32>
    %224 = vector.broadcast %221 : f32 to vector<16x16xf32>
    %225 = arith.mulf %223, %224 : vector<16x16xf32>
    %226 = arith.addf %220, %225 : vector<16x16xf32>
    %c34 = arith.constant 34 : index
    %227 = memref.load %arg2[%c34] : memref<36xf32, #tpu.memory_space<smem>>
    %c3_134 = arith.constant 3 : index
    %c2_135 = arith.constant 2 : index
    %c1_136 = arith.constant 1 : index
    %228 = vector.load %arg5[%c3_134, %c2_135, %c1_136] : memref<4x18x18xf32, #tpu.memory_space<vmem>>, vector<1x16x16xf32>
    %229 = vector.shape_cast %228 : vector<1x16x16xf32> to vector<16x16xf32>
    %230 = vector.broadcast %227 : f32 to vector<16x16xf32>
    %231 = arith.mulf %229, %230 : vector<16x16xf32>
    %232 = arith.addf %226, %231 : vector<16x16xf32>
    %c35 = arith.constant 35 : index
    %233 = memref.load %arg2[%c35] : memref<36xf32, #tpu.memory_space<smem>>
    %c3_137 = arith.constant 3 : index
    %c2_138 = arith.constant 2 : index
    %c2_139 = arith.constant 2 : index
    %234 = vector.load %arg5[%c3_137, %c2_138, %c2_139] : memref<4x18x18xf32, #tpu.memory_space<vmem>>, vector<1x16x16xf32>
    %235 = vector.shape_cast %234 : vector<1x16x16xf32> to vector<16x16xf32>
    %236 = vector.broadcast %233 : f32 to vector<16x16xf32>
    %237 = arith.mulf %235, %236 : vector<16x16xf32>
    %238 = arith.addf %232, %237 : vector<16x16xf32>
    %c0_140 = arith.constant 0 : index
    %239 = memref.load %arg3[%c0_140] : memref<1xf32, #tpu.memory_space<smem>>
    %240 = vector.broadcast %239 : f32 to vector<16x16xf32>
    %241 = arith.addf %238, %240 : vector<16x16xf32>
    %242 = arith.negf %241 : vector<16x16xf32>
    %243 = math.exp %242 : vector<16x16xf32>
    %cst_141 = arith.constant 1.000000e+00 : f32
    %244 = vector.broadcast %cst_141 : f32 to vector<16x16xf32>
    %245 = arith.addf %244, %243 : vector<16x16xf32>
    %246 = arith.divf %244, %245 : vector<16x16xf32>
    %c0_142 = arith.constant 0 : index
    %c0_143 = arith.constant 0 : index
    %c0_144 = arith.constant 0 : index
    %c0_145 = arith.constant 0 : index
    %247 = vector.load %arg4[%c0_142, %c0_143, %c0_144, %c0_145] : memref<1x1x16x16xf32, #tpu.memory_space<vmem>>, vector<1x1x16x16xf32>
    %248 = vector.shape_cast %247 : vector<1x1x16x16xf32> to vector<16x16xf32>
    %249 = vector.shape_cast %246 : vector<16x16xf32> to vector<1x1x16x16xf32>
    tpu.vector_store %arg4[%c0_142, %c0_143, %c0_144, %c0_145], %249 {strides = array<i32>} : memref<1x1x16x16xf32, #tpu.memory_space<vmem>>, vector<1x1x16x16xf32>,
    return
  }
  func.func @transform_0(%arg0: i32) -> (i32, i32, i32, i32) {
    %c0_i32 = arith.constant 0 : i32
    %c0_i32_0 = arith.constant 0 : i32
    %c0_i32_1 = arith.constant 0 : i32
    %c0_i32_2 = arith.constant 0 : i32
    return %arg0, %c0_i32, %c0_i32_0, %c0_i32_1 : i32, i32, i32, i32
  }
  func.func @transform_1(%arg0: i32) -> i32 {
    %c0_i32 = arith.constant 0 : i32
    %c0_i32_0 = arith.constant 0 : i32
    return %c0_i32 : i32
  }
  func.func @transform_2(%arg0: i32) -> i32 {
    %c0_i32 = arith.constant 0 : i32
    %c0_i32_0 = arith.constant 0 : i32
    return %c0_i32 : i32
  }
  func.func @transform_3(%arg0: i32) -> (i32, i32, i32, i32) {
    %c0_i32 = arith.constant 0 : i32
    %c0_i32_0 = arith.constant 0 : i32
    %c0_i32_1 = arith.constant 0 : i32
    %c0_i32_2 = arith.constant 0 : i32
    return %arg0, %c0_i32, %c0_i32_0, %c0_i32_1 : i32, i32, i32, i32
  }
}

</mosaic_0001>

<bundles_post_ra>
// kernel: tpu_custom_call.1
= control target key start
LH: loop header
LB: loop body
LE: loop exit
PB: predicated region body
PF: predicated region fallthrough
CT: control target
= control target key end

     0   :  { %s1481_s0 = inlined_call_operand.hbm [shape: f32[2,4,16,16], index: 0, kind: input, shape index: {}]   ;;  %s1482_s1 = inlined_call_operand.vmem [shape: f32[36], index: 1, kind: input, shape index: {}]   ;;  %s1483_s2 = inlined_call_operand.<no memory space> [shape: f32[1], index: 2, kind: input, shape index: {}]   ;;  %s1484_s3 = inlined_call_operand.hbm [shape: f32[2,1,16,16], index: 3, kind: output, shape index: {}]  }
   0x1   :  { %8 = sst [smem:[#allocation3]] %s1483_s2 }
   0x2   :  { %9 = vsyncpa [#allocation5], 0 }
   0x3   :  { %11 = vsyncpa [#allocation5 + $0x1], 0 }
   0x4   :  { %12 = vsyncpa [#allocation7], 0 }
   0x5   :  { %13 = vsyncpa [#allocation6], 0 }
   0x6   :  { %15 = vsyncpa [#allocation6 + $0x1], 0  ;;  %s1104_s14 = smov 0   ;;  %s1106_s15 = smov 0  }
   0x7   :  { %s1108_s16 = smov 0   ;;  %s1110_s17 = smov 0  }
   0x8 LB: > { %s1125_s2 = sadd.s32 4294967295, %s1068_s17   ;;  %s823_s18 = sadd.s32 4294967294, %s1068_s17   ;;  %s1068_s17 = sphi %s1110_s17, %s1506_s17   ;;  %s1064_s16 = sphi %s1108_s16, %s1505_s16   ;;  %s1060_s15 = sphi %s1106_s15, %s1504_s15   ;;  %s1056_s14 = sphi %s1104_s14, %s1503_s14  }
   0x9   : > { %s1129_s19 = sadd.s32 1, %s1068_s17   ;;  %s28_s20 = sadd.s32 1, %s1064_s16 }
   0xa   : > { %s25_s21 = ssub.s32 %s1068_s17, %s1129_s19  ;;  %p35_p0 = scmp.ne.s32.totalorder %s1064_s16, %s1060_s15 }
   0xb   : > { %p26_p1 = scmp.eq.s32.totalorder %s25_s21, 0  ;;  %p36_p2 = scmp.eq.s32.totalorder %s1068_s17, 0 }
   0xc   : > { %p41_p3 = scmp.ne.s32.totalorder %s1060_s15, %s1056_s14  ;;  %p1486_p4 = scmp.eq.s32.totalorder %s1125_s2, 0 }
   0xd   : > { %s1141_s22 = scalar_select %p26_p1, %s1064_s16, %s28_s20  }
   0xe   : > { %p1143_p5 = por %p36_p2, %p35_p0  ;;  %p1149_p6 = por %p1486_p4, %p41_p3 }
   0xf   : > { %p107_p7 = scmp.eq.s32.totalorder %s1125_s2, 1  ;;  %p113_p8 = scmp.eq.s32.totalorder %s823_s18, 1 }
  0x10   : > { %s1490_s24 = scalar_select %p1149_p6, 1, 0 }
  0x11   : > { %p824_p9 = scmp.ge.s32.totalorder %s1068_s17, 1  ;;  %p120_p10 = scmp.lt.s32.totalorder %s1068_s17, 3 }
  0x12   : > { %p1156_p11 = por %p107_p7, %p35_p0  ;;  %p1160_p12 = por %p113_p8, %p41_p3 }
  0x13   : > { %p1164_p13 = pnand %p824_p9, %p120_p10  ;;  %s133_s30 = sshll.u32 %s1482_s1, 4  ;;  %s134_s30 = int_to_ptr.vmem [resolvable:$true] %s133_s30 }
  0x14   : > { %s1491_s25 = scalar_select %p1156_p11, 1, 0 }
  0x15   : > { %s1492_s26 = scalar_select %p1160_p12, 1, 0 }
  0x16   : > { %s1493_s27 = scalar_select %p1164_p13, 1, 0 }
  0x17   : > { %p892_p1 = pneg %p1164_p13  ;;  %p905_p2 = scmp.lt.s32.totalorder %s1068_s17, 2 }
  0x18   : > { %s147_s5 = sand.u32 1, %s1064_s16   ;;  %s957_s8 = scalar_lea.vmem %s134_s30, 16 }
  0x19   : > { %p1177_p7 = pnand %p892_p1, %p1486_p4  ;;  %p1184_p3 = pnand %p905_p2, %p1143_p5 }
  0x1a   : > { %s827_s7 = sshll.u32 %s147_s5, 6  ;;  %p958_p8 = scmp.ne.s32.totalorder %s134_s30, %s957_s8 }
  0x1b   : > { %p959_p9 = pneg %p1177_p7  ;;  %p965_p12 = scmp.lt.s32.totalorder %s134_s30, %s134_s30 }
  0x1c   : > { %p966_p11 = scmp.lt.s32.totalorder %s957_s8, %s957_s8 }
  0x1d   : > { %p960_p10 = pnand %p959_p9, %p958_p8 }
  0x1e   : > { %p967_p1 = por %p966_p11, %p965_p12 }
  0x1f   : > { %p961_p0 = pneg %p960_p10 }
  0x21   : > { %p968_p4 = pnand %p967_p1, %p961_p0 }
  0x23   : > { %971 = shalt.err (!%p968_p4)
}
  0x24   : > { %s1070_s9 = smov [#allocation8]   ;;  %s882_s10 = sshll.u32 %s1068_s17, 10 }
  0x25   : > { %895 = dma.vmem_to_smem (!%p1177_p7), %s134_s30, 16, %s1070_s9, [#allocation7]  }
  0x26   : > { %s151_s11 = scalar_lea.vmem [#allocation4], %s827_s7  ;;  %s1196_s20 = scalar_lea.hbm %s1481_s0, %s882_s10 }
  0x27   : > { %s158_s12 = sshll.u32 %s151_s11, 4  ;;  %s1200_s21 = scalar_lea.sflag [#allocation5], %s147_s5  ;;  %s1198_s12 = int_to_ptr.vmem [resolvable:$true] %s158_s12 }
  0x28   : > { %s972_s23 = scalar_lea.hbm %s1196_s20, 1024  ;;  %p974_p5 = pneg %p1184_p3 }
  0x29   : > { %p973_p4 = scmp.ne.s32.totalorder %s1196_s20, %s972_s23  ;;  %s977_s30 = scalar_lea.hbm %s1481_s0, 2048 }
  0x2a   : > { %p978_p0 = scmp.lt.s32.totalorder %s1196_s20, %s1481_s0  ;;  %p979_p2 = scmp.lt.s32.totalorder %s977_s30, %s972_s23 }
  0x2b   : > { %p975_p11 = pnand %p974_p5, %p973_p4 }
  0x2c   : > { %p980_p7 = por %p979_p2, %p978_p0 }
  0x2d   : > { %p976_p12 = pneg %p975_p11 }
  0x2f   : > { %p981_p8 = pnand %p980_p7, %p976_p12 }
  0x31   : > { %984 = shalt.err (!%p981_p8)
}
  0x32   : > { %s985_s5 = scalar_lea.vmem %s1198_s12, 1024  ;;  %s1071_s8 = smov [#allocation4]  }
  0x33   : > { %p986_p9 = scmp.ne.s32.totalorder %s1198_s12, %s985_s5  ;;  %s990_s9 = sshll.u32 %s1071_s8, 4  ;;  %s991_s9 = int_to_ptr.vmem [resolvable:$false] %s990_s9 }
  0x34   : > { %s992_s10 = scalar_lea.vmem %s991_s9, 2048  ;;  %p993_p4 = scmp.lt.s32.totalorder %s1198_s12, %s991_s9 }
  0x35   : > { %p988_p10 = pnand %p986_p9, %p974_p5  ;;  %p994_p11 = scmp.lt.s32.totalorder %s992_s10, %s985_s5 }
  0x37   : > { %p989_p1 = pneg %p988_p10  ;;  %p995_p6 = por %p994_p11, %p993_p4 }
  0x39   : > { %p996_p13 = pnand %p995_p6, %p989_p1 }
  0x3b   : > { %999 = shalt.err (!%p996_p13)
}
  0x3c   : > { %s1072_s11 = smov 128   ;;  %s1073_s13 = smov 8  }
  0x3d   : > { %899 = dma.hbm_to_vmem [thread:$0]  (!%p1184_p3), %s1196_s20, 1024, %s1198_s12, %s1200_s21, %s1072_s11, %s1072_s11, %s1073_s13  }
  0x3e   : > { %p1496_p5 = scmp.ne.s32.totalorder %s1493_s27, 0 }
  0x3f   : > { %s1224_s18 = sand.u32 (!%p1496_p5), 1, %s1060_s15   ;;  %p1497_p6 = scmp.ne.s32.totalorder (!%p1496_p5), %s1490_s24, 0 }
  0x40   : > { %170 = sbr.rel (%p1496_p5) target bundleno = 463 (0x1cf), region = 32  ;;  %s831_s23 = sshll.u32 (!%p1496_p5), %s1224_s18, 6 }
  0x41   : > { %s173_s28 = scalar_lea.sflag (!%p1496_p5), [#allocation5], %s1224_s18  ;;  %s1228_s29 = scalar_lea.vmem (!%p1496_p5), [#allocation4], %s831_s23 }
  0x45   : > { %1043 = dma.done.wait (%p1497_p6), %s173_s28, 1024  }
  0x46   : > { %1045 = vsyncadd (%p1497_p6), %s173_s28, 4294966272  ;;  %p1498_p13 = scmp.eq.s32.totalorder %s1125_s2, 0 }
  0x48   : > { %1047 = dma.done.wait (%p1498_p13), [#allocation7], 16   ;;  %p1499_p3 = pmov %p1498_p13 }
  0x4a   : > { %1049 = vsyncadd (%p1499_p3), [#allocation7], 4294967280 }
  0x4b   : > { %185 = sfence }
  0x4c   : > { %v218_v0 = vld [vmem:[%s1228_s29] sm:$0xff]  ;;  %v834_v1 = vld [vmem:[%s1228_s29 + $0x10] sm:$0xff]  ;;  %vm204_vm0 = vcmask 146432   ;;  %s1074_s27 = smov 1   ;;  %vm207_vm1 = vcmask 140288   ;;  %v219_v2 = vld [vmem:[%s1228_s29 + $0x8] sm:$0xff] }
  0x4d   : > { %222 = vrot.lane.b32.xlu0 %v218_v0, %s1074_s27  ;;  %236 = vrot.lane.b32.xlu1 %v834_v1, %s1074_s27  ;;  %v835_v3 = vld [vmem:[%s1228_s29 + $0x18] sm:$0xff]  ;;  %v1075_v4 = vmov 0.0   ;;  %v836_v5 = vld [vmem:[%s1228_s29 + $0x20] sm:$0xff]  ;;  %vm228_vm2 = vcmask 138248   ;;  %s840_s24 = sld [smem:[#allocation8 + $0x1]]  ;;  %s1076_s21 = smov 127  }
  0x4e   : > { %205 = vst.msk [vmem:[#allocation2] sm:$0xff] %vm204_vm0, %v1075_v4  ;;  %206 = vst.msk [vmem:[#allocation2 + $0x8] sm:$0xff] %vm204_vm0, %v1075_v4  ;;  %v837_v6 = vld [vmem:[%s1228_s29 + $0x28] sm:$0xff]  ;;  %v838_v7 = vld [vmem:[%s1228_s29 + $0x30] sm:$0xff]  ;;  %s1248_s6 = sld [smem:[#allocation8 + $0x2]]  ;;  %s1077_s4 = smov 126  }
  0x4f   : > { %209 = vst.msk [vmem:[#allocation2 + $0x18] sm:$0xff] %vm204_vm0, %v1075_v4  ;;  %210 = vst.msk [vmem:[#allocation2 + $0x20] sm:$0xff] %vm204_vm0, %v1075_v4  ;;  %v839_v8 = vld [vmem:[%s1228_s29 + $0x38] sm:$0xff]  ;;  %s1252_s12 = sld [smem:[#allocation8 + $0x4]]  ;;  %vm721_vm3 = vcmask 130048   ;;  %p1500_p0 = scmp.ne.s32.totalorder %s1491_s25, 0 }
  0x50   : > { %212 = vst.msk [vmem:[#allocation2 + $0x30] sm:$0xff] %vm204_vm0, %v1075_v4  ;;  %213 = vst.msk [vmem:[#allocation2 + $0x38] sm:$0xff] %vm204_vm0, %v1075_v4  ;;  %s1260_s20 = sld [smem:[#allocation8 + $0x5]] }
  0x51   : > { %215 = vst.msk [vmem:[#allocation2 + $0x48] sm:$0xff] %vm204_vm0, %v1075_v4  ;;  %216 = vst.msk [vmem:[#allocation2 + $0x50] sm:$0xff] %vm204_vm0, %v1075_v4  ;;  %224 = vrot.lane.b32.xlu0 %v219_v2, %s1074_s27  ;;  %238 = vrot.lane.b32.xlu1 %v835_v3, %s1074_s27  ;;  %s846_s30 = sld [smem:[#allocation8 + $0x7]] }
  0x52   : > { %208 = vst.msk [vmem:[#allocation2 + $0x10] sm:$0x3] %vm207_vm1, %v1075_v4  ;;  %211 = vst.msk [vmem:[#allocation2 + $0x28] sm:$0x3] %vm207_vm1, %v1075_v4  ;;  %s847_s7 = sld [smem:[#allocation8 + $0x8]] }
  0x53   : > { %214 = vst.msk [vmem:[#allocation2 + $0x40] sm:$0x3] %vm207_vm1, %v1075_v4  ;;  %217 = vst.msk [vmem:[#allocation2 + $0x58] sm:$0x3] %vm207_vm1, %v1075_v4  ;;  %v282_v13 = vstv %s840_s24  ;;  %s849_s5 = sld [smem:[#allocation8 + $0xa]] }
  0x54   : > { %v296_v18 = vstv %s1248_s6  ;;  %s850_s8 = sld [smem:[#allocation8 + $0xb]] }
  0x55   : > { %250 = vrot.lane.b32.xlu0 %v836_v5, %s1074_s27  ;;  %252 = vrot.lane.b32.xlu1 %v837_v6, %s1074_s27  ;;  %v318_v25 = vstv %s1252_s12  ;;  %s852_s9 = sld [smem:[#allocation8 + $0xd]] }
  0x56   : > { %v332_v29 = vstv %s1260_s20  ;;  %s853_s10 = sld [smem:[#allocation8 + $0xe]] }
  0x57   : > { %v354_v33 = vstv %s846_s30  ;;  %s855_s11 = sld [smem:[#allocation8 + $0x10]] }
  0x58   : > { %v368_v37 = vstv %s847_s7  ;;  %s856_s13 = sld [smem:[#allocation8 + $0x11]] }
  0x59   : > { %264 = vrot.lane.b32.xlu0 %v838_v7, %s1074_s27  ;;  %266 = vrot.lane.b32.xlu1 %v839_v8, %s1074_s27  ;;  %v390_v39 = vstv %s849_s5  ;;  %s858_s23 = sld [smem:[#allocation8 + $0x13]] }
  0x5a   : > { %v404_v45 = vstv %s850_s8  ;;  %s859_s28 = sld [smem:[#allocation8 + $0x14]] }
  0x5b   : > { %v426_v49 = vstv %s852_s9  ;;  %s861_s29 = sld [smem:[#allocation8 + $0x16]] }
  0x5c   : > { %v440_v53 = vstv %s853_s10  ;;  %s862_s27 = sld [smem:[#allocation8 + $0x17]] }
  0x5d   : > { %v462_v57 = vstv %s855_s11  ;;  %s864_s24 = sld [smem:[#allocation8 + $0x19]] }
  0x5e   : > { %v476_v61 = vstv %s856_s13  ;;  %s865_s6 = sld [smem:[#allocation8 + $0x1a]] }
  0x5f   : > { %v498_v63 = vstv %s858_s23  ;;  %s867_s12 = sld [smem:[#allocation8 + $0x1c]] }
  0x60   : > { %v512_v4 = vstv %s859_s28  ;;  %s868_s20 = sld [smem:[#allocation8 + $0x1d]] }
  0x61   : > { %s870_s30 = sld [smem:[#allocation8 + $0x1f]] }
  0x62   : > { %s871_s7 = sld [smem:[#allocation8 + $0x20]] }
  0x63   : > { %s873_s5 = sld [smem:[#allocation8 + $0x22]] }
  0x64   : > { %s874_s8 = sld [smem:[#allocation8 + $0x23]] }
  0x65   : > { %s273_s9 = sld [smem:[#allocation8]] }
  0x66   : > { %s842_s10 = sld [smem:[#allocation8 + $0x3]] }
  0x67   : > { %s845_s11 = sld [smem:[#allocation8 + $0x6]] }
  0x68   : > { %s854_s13 = sld [smem:[#allocation8 + $0xf]] }
  0x69   : > { %s857_s23 = sld [smem:[#allocation8 + $0x12]] }
  0x6a   : > { %s860_s28 = sld [smem:[#allocation8 + $0x15]] }
  0xbf   : > { %v223_v9 = vpop.permute.xlu0 %222  ;;  %v237_v10 = vpop.permute.xlu1 %236 }
  0xc0   : > { %229 = vst.msk [vmem:[#allocation2 + $0x1] sm:$0xff] %vm228_vm2, %v223_v9  ;;  %243 = vst.msk [vmem:[#allocation2 + $0x19] sm:$0xff] %vm228_vm2, %v237_v10  ;;  %v534_v9 = vstv %s861_s29  ;;  %s863_s29 = sld [smem:[#allocation8 + $0x18]] }
  0xc3   : > { %v225_v11 = vpop.permute.xlu0 %224  ;;  %v239_v12 = vpop.permute.xlu1 %238 }
  0xc4   : > { %230 = vst.msk [vmem:[#allocation2 + $0x9] sm:$0xff] %vm228_vm2, %v225_v11  ;;  %244 = vst.msk [vmem:[#allocation2 + $0x21] sm:$0xff] %vm228_vm2, %v239_v12 }
  0xc7   : > { %v1254_v14 = vld [vmem:[#allocation2] sm:$0xff]  ;;  %v251_v15 = vpop.permute.xlu0 %250  ;;  %v253_v16 = vpop.permute.xlu1 %252  ;;  %v1293_v38 = vld [vmem:[#allocation2 + $0x18] sm:$0xff] }
  0xc8   : > { %v283_v17 = vmul.f32 %v282_v13, %v1254_v14  ;;  %257 = vst.msk [vmem:[#allocation2 + $0x31] sm:$0xff] %vm228_vm2, %v251_v15  ;;  %258 = vst.msk [vmem:[#allocation2 + $0x39] sm:$0xff] %vm228_vm2, %v253_v16  ;;  %v297_v23 = vmul.f32 %v296_v18, %v1254_v14  ;;  %v1269_v24 = vld [vmem:[#allocation2 + $0x1] sm:$0xff]  ;;  %v391_v42 = vmul.f32 %v390_v39, %v1293_v38  ;;  %v1307_v48 = vld [vmem:[#allocation2 + $0x19] sm:$0xff] }
  0xc9   : > { %v319_v27 = vmul.f32 %v318_v25, %v1269_v24  ;;  %v333_v31 = vmul.f32 %v332_v29, %v1269_v24  ;;  %v405_v47 = vmul.f32 %v404_v45, %v1293_v38  ;;  %v427_v51 = vmul.f32 %v426_v49, %v1307_v48 }
  0xca   : > { %287 = vrot.lane.b32.xlu0 %v283_v17, %s1076_s21  ;;  %v441_v55 = vmul.f32 %v440_v53, %v1307_v48 }
  0xcb   : > { %v1263_v19 = vld [vmem:[#allocation2 + $0x8] sm:$0xff]  ;;  %v265_v20 = vpop.permute.xlu0 %264  ;;  %v267_v21 = vpop.permute.xlu1 %266  ;;  %v1301_v44 = vld [vmem:[#allocation2 + $0x20] sm:$0xff] }
  0xcc   : > { %v284_v22 = vmul.f32 %v282_v13, %v1263_v19  ;;  %271 = vst.msk [vmem:[#allocation2 + $0x49] sm:$0xff] %vm228_vm2, %v265_v20  ;;  %272 = vst.msk [vmem:[#allocation2 + $0x51] sm:$0xff] %vm228_vm2, %v267_v21  ;;  %v298_v26 = vmul.f32 %v296_v18, %v1263_v19  ;;  %v1276_v28 = vld [vmem:[#allocation2 + $0x9] sm:$0xff]  ;;  %v392_v46 = vmul.f32 %v390_v39, %v1301_v44  ;;  %v1313_v52 = vld [vmem:[#allocation2 + $0x21] sm:$0xff]  ;;  %v548_v13 = vstv %s862_s27  ;;  %s866_s27 = sld [smem:[#allocation8 + $0x1b]] }
  0xcd   : > { %v320_v30 = vmul.f32 %v318_v25, %v1276_v28  ;;  %v1283_v32 = vld [vmem:[#allocation2 + $0x2] sm:$0xff]  ;;  %v334_v34 = vmul.f32 %v332_v29, %v1276_v28  ;;  %v1289_v36 = vld [vmem:[#allocation2 + $0xa] sm:$0xff]  ;;  %v406_v50 = vmul.f32 %v404_v45, %v1301_v44  ;;  %v428_v54 = vmul.f32 %v426_v49, %v1313_v52  ;;  %v1319_v56 = vld [vmem:[#allocation2 + $0x1a] sm:$0xff] }
  0xce   : > { %289 = vrot.lane.b32.xlu1 %v284_v22, %s1076_s21  ;;  %301 = vrot.lane.b32.xlu0 %v297_v23, %s1077_s4  ;;  %v355_v35 = vmul.f32 %v354_v33, %v1283_v32  ;;  %v356_v40 = vmul.f32 %v354_v33, %v1289_v36  ;;  %v369_v41 = vmul.f32 %v368_v37, %v1283_v32  ;;  %v1325_v60 = vld [vmem:[#allocation2 + $0x22] sm:$0xff]  ;;  %v570_v18 = vstv %s864_s24  ;;  %s869_s24 = sld [smem:[#allocation8 + $0x1e]] }
  0xcf   : > { %v370_v43 = vmul.f32 %v368_v37, %v1289_v36  ;;  %v442_v58 = vmul.f32 %v440_v53, %v1313_v52  ;;  %v463_v59 = vmul.f32 %v462_v57, %v1319_v56  ;;  %v1329_v62 = vld [vmem:[#allocation2 + $0x30] sm:$0xff]  ;;  %v464_v0 = vmul.f32 %v462_v57, %v1325_v60  ;;  %v1336_v3 = vld [vmem:[#allocation2 + $0x38] sm:$0xff] }
  0xd0   : > { %v477_v1 = vmul.f32 %v476_v61, %v1319_v56  ;;  %v499_v2 = vmul.f32 %v498_v63, %v1329_v62  ;;  %v478_v5 = vmul.f32 %v476_v61, %v1325_v60  ;;  %v500_v6 = vmul.f32 %v498_v63, %v1336_v3  ;;  %v1343_v8 = vld [vmem:[#allocation2 + $0x31] sm:$0xff]  ;;  %v1349_v12 = vld [vmem:[#allocation2 + $0x39] sm:$0xff] }
  0xd1   : > { %v513_v7 = vmul.f32 %v512_v4, %v1329_v62  ;;  %v514_v10 = vmul.f32 %v512_v4, %v1336_v3  ;;  %v535_v11 = vmul.f32 %v534_v9, %v1343_v8  ;;  %v536_v15 = vmul.f32 %v534_v9, %v1349_v12  ;;  %v1355_v17 = vld [vmem:[#allocation2 + $0x32] sm:$0xff]  ;;  %v1361_v22 = vld [vmem:[#allocation2 + $0x3a] sm:$0xff] }
  0xd2   : > { %303 = vrot.lane.b32.xlu1 %v298_v26, %s1077_s4  ;;  %323 = vrot.lane.b32.xlu0 %v319_v27, %s1076_s21  ;;  %v549_v16 = vmul.f32 %v548_v13, %v1343_v8  ;;  %v550_v20 = vmul.f32 %v548_v13, %v1349_v12  ;;  %v571_v21 = vmul.f32 %v570_v18, %v1355_v17  ;;  %v584_v23 = vstv %s865_s6  ;;  %s872_s6 = sld [smem:[#allocation8 + $0x21]] }
  0xd3   : > { %v1365_v25 = vld [vmem:[#allocation2 + $0x48] sm:$0xff]  ;;  %v606_v26 = vstv %s867_s12  ;;  %v572_v27 = vmul.f32 %v570_v18, %v1361_v22  ;;  %v585_v29 = vmul.f32 %v584_v23, %v1355_v17  ;;  %v620_v33 = vstv %s868_s20  ;;  %s705_s12 = sld [smem:[#allocation3]]  ;;  %s833_s20 = sshll.u32 %s1224_s18, 4 }
  0xd4   : > { %v621_v37 = vmul.f32 %v620_v33, %v1365_v25  ;;  %v1379_v39 = vld [vmem:[#allocation2 + $0x49] sm:$0xff]  ;;  %v656_v45 = vstv %s871_s7  ;;  %v276_v61 = vstv %s273_s9  ;;  %s203_s7 = scalar_lea.vmem [#allocation9], %s833_s20 }
  0xd5   : > { %v1391_v49 = vld [vmem:[#allocation2 + $0x4a] sm:$0xff] }
  0xd6   : > { %325 = vrot.lane.b32.xlu1 %v320_v30, %s1076_s21  ;;  %337 = vrot.lane.b32.xlu0 %v333_v31, %s1077_s4  ;;  %v607_v30 = vmul.f32 %v606_v26, %v1365_v25  ;;  %v1372_v31 = vld [vmem:[#allocation2 + $0x50] sm:$0xff] }
  0xda   : > { %339 = vrot.lane.b32.xlu1 %v334_v34, %s1077_s4  ;;  %359 = vrot.lane.b32.xlu0 %v355_v35, %s1076_s21  ;;  %v586_v34 = vmul.f32 %v584_v23, %v1361_v22  ;;  %v608_v35 = vmul.f32 %v606_v26, %v1372_v31 }
  0xde   : > { %361 = vrot.lane.b32.xlu1 %v356_v40, %s1076_s21  ;;  %373 = vrot.lane.b32.xlu0 %v369_v41, %s1077_s4  ;;  %v642_v40 = vstv %s870_s30  ;;  %v622_v41 = vmul.f32 %v620_v33, %v1372_v31  ;;  %s883_s30 = sshll.u32 %s1125_s2, 8  ;;  %s1078_s2 = smov [#allocation9]  }
  0xe2   : > { %375 = vrot.lane.b32.xlu1 %v370_v43, %s1077_s4  ;;  %395 = vrot.lane.b32.xlu0 %v391_v42, %s1076_s21  ;;  %v643_v42 = vmul.f32 %v642_v40, %v1379_v39  ;;  %v1385_v43 = vld [vmem:[#allocation2 + $0x51] sm:$0xff] }
  0xe6   : > { %397 = vrot.lane.b32.xlu1 %v392_v46, %s1076_s21  ;;  %409 = vrot.lane.b32.xlu0 %v405_v47, %s1077_s4  ;;  %v644_v46 = vmul.f32 %v642_v40, %v1385_v43  ;;  %v657_v47 = vmul.f32 %v656_v45, %v1379_v39 }
  0xea   : > { %411 = vrot.lane.b32.xlu1 %v406_v50, %s1077_s4  ;;  %431 = vrot.lane.b32.xlu0 %v427_v51, %s1076_s21  ;;  %v678_v50 = vstv %s873_s5  ;;  %v658_v51 = vmul.f32 %v656_v45, %v1385_v43  ;;  %s738_s5 = sshll.u32 %s203_s7, 4  ;;  %s1438_s5 = int_to_ptr.vmem [resolvable:$true] %s738_s5 }
  0xeb   : > { %v679_v53 = vmul.f32 %v678_v50, %v1391_v49 }
  0xee   : > { %433 = vrot.lane.b32.xlu1 %v428_v54, %s1076_s21  ;;  %445 = vrot.lane.b32.xlu0 %v441_v55, %s1077_s4  ;;  %v1397_v54 = vld [vmem:[#allocation2 + $0x52] sm:$0xff]  ;;  %v692_v55 = vstv %s874_s8 }
  0xef   : > { %v680_v57 = vmul.f32 %v678_v50, %v1397_v54 }
  0xf2   : > { %447 = vrot.lane.b32.xlu1 %v442_v58, %s1077_s4  ;;  %467 = vrot.lane.b32.xlu0 %v463_v59, %s1076_s21  ;;  %v693_v58 = vmul.f32 %v692_v55, %v1391_v49  ;;  %v694_v59 = vmul.f32 %v692_v55, %v1397_v54 }
  0xf6   : > { %469 = vrot.lane.b32.xlu1 %v464_v0, %s1076_s21  ;;  %481 = vrot.lane.b32.xlu0 %v477_v1, %s1077_s4  ;;  %v277_v0 = vmul.f32 %v276_v61, %v1254_v14  ;;  %v312_v1 = vstv %s842_s10  ;;  %s1436_s10 = scalar_lea.hbm %s1484_s3, %s883_s30 }
  0xf7   : > { %v313_v9 = vmul.f32 %v312_v1, %v1269_v24  ;;  %v314_v18 = vmul.f32 %v312_v1, %v1276_v28 }
  0xfa   : > { %483 = vrot.lane.b32.xlu1 %v478_v5, %s1077_s4  ;;  %503 = vrot.lane.b32.xlu0 %v499_v2, %s1076_s21 }
  0xfe   : > { %505 = vrot.lane.b32.xlu1 %v500_v6, %s1076_s21  ;;  %517 = vrot.lane.b32.xlu0 %v513_v7, %s1077_s4  ;;  %v278_v6 = vmul.f32 %v276_v61, %v1263_v19 }
 0x102   : > { %519 = vrot.lane.b32.xlu1 %v514_v10, %s1077_s4  ;;  %539 = vrot.lane.b32.xlu0 %v535_v11, %s1076_s21 }
 0x106   : > { %541 = vrot.lane.b32.xlu1 %v536_v15, %s1076_s21  ;;  %553 = vrot.lane.b32.xlu0 %v549_v16, %s1077_s4 }
 0x10a   : > { %555 = vrot.lane.b32.xlu1 %v550_v20, %s1077_s4  ;;  %575 = vrot.lane.b32.xlu0 %v571_v21, %s1076_s21  ;;  %v348_v20 = vstv %s845_s11  ;;  %s725_s11 = scalar_lea.sflag [#allocation6], %s1224_s18 }
 0x10e   : > { %577 = vrot.lane.b32.xlu1 %v572_v27, %s1076_s21  ;;  %589 = vrot.lane.b32.xlu0 %v585_v29, %s1077_s4  ;;  %v349_v29 = vmul.f32 %v348_v20, %v1283_v32 }
 0x112   : > { %591 = vrot.lane.b32.xlu1 %v586_v34, %s1077_s4  ;;  %611 = vrot.lane.b32.xlu0 %v607_v30, %s1076_s21 }
 0x116   : > { %613 = vrot.lane.b32.xlu1 %v608_v35, %s1076_s21  ;;  %625 = vrot.lane.b32.xlu0 %v621_v37, %s1077_s4  ;;  %v350_v35 = vmul.f32 %v348_v20, %v1289_v36 }
 0x11a   : > { %627 = vrot.lane.b32.xlu1 %v622_v41, %s1077_s4  ;;  %647 = vrot.lane.b32.xlu0 %v643_v42, %s1076_s21 }
 0x11e   : > { %649 = vrot.lane.b32.xlu1 %v644_v46, %s1076_s21  ;;  %661 = vrot.lane.b32.xlu0 %v657_v47, %s1077_s4 }
 0x122   : > { %663 = vrot.lane.b32.xlu1 %v658_v51, %s1077_s4  ;;  %683 = vrot.lane.b32.xlu0 %v679_v53, %s1076_s21 }
 0x126   : > { %685 = vrot.lane.b32.xlu1 %v680_v57, %s1076_s21  ;;  %697 = vrot.lane.b32.xlu0 %v693_v58, %s1077_s4  ;;  %s848_s21 = sld [smem:[#allocation8 + $0x9]] }
 0x12a   : > { %699 = vrot.lane.b32.xlu1 %v694_v59, %s1077_s4  ;;  %s851_s4 = sld [smem:[#allocation8 + $0xc]] }
 0x12c   : > { %v384_v37 = vstv %s848_s21  ;;  %s1000_s21 = scalar_lea.vmem %s1438_s5, 256 }
 0x12d   : > { %v385_v46 = vmul.f32 %v384_v37, %v1293_v38  ;;  %v386_v55 = vmul.f32 %v384_v37, %v1301_v44  ;;  %p1001_p12 = scmp.ne.s32.totalorder %s1438_s5, %s1000_s21 }
 0x12f   : > { %p1002_p2 = pnand %p1001_p12, %p1500_p0 }
 0x130   : > { %v420_v57 = vstv %s851_s4  ;;  %s1004_s4 = sshll.u32 %s1078_s2, 4  ;;  %s1005_s4 = int_to_ptr.vmem [resolvable:$false] %s1004_s4 }
 0x131   : > { %p1003_p7 = pneg %p1002_p2  ;;  %p1007_p8 = scmp.lt.s32.totalorder %s1438_s5, %s1005_s4 }
 0x13c   : > { %v288_v63 = vpop.permute.xlu0 %287 }
 0x13d   : > { %v293_v2 = vadd.f32 %v288_v63, %v277_v0  ;;  %v421_v0 = vmul.f32 %v420_v57, %v1307_v48 }
 0x140   : > { %v290_v4 = vpop.permute.xlu1 %289  ;;  %v302_v5 = vpop.permute.xlu0 %301 }
 0x141   : > { %v307_v7 = vadd.f32 %v302_v5, %v293_v2  ;;  %v294_v10 = vadd.f32 %v290_v4, %v278_v6  ;;  %v422_v6 = vmul.f32 %v420_v57, %v1313_v52 }
 0x143   : > { %v315_v11 = vadd.f32 %v313_v9, %v307_v7  ;;  %v456_v7 = vstv %s854_s13  ;;  %s1006_s13 = scalar_lea.vmem %s1005_s4, 512 }
 0x144   : > { %v304_v13 = vpop.permute.xlu1 %303  ;;  %v324_v15 = vpop.permute.xlu0 %323  ;;  %p1008_p9 = scmp.lt.s32.totalorder %s1006_s13, %s1000_s21 }
 0x145   : > { %v308_v16 = vadd.f32 %v304_v13, %v294_v10  ;;  %v329_v14 = vadd.f32 %v324_v15, %v315_v11  ;;  %v457_v15 = vmul.f32 %v456_v7, %v1319_v56 }
 0x146   : > { %p1009_p10 = por %p1008_p9, %p1007_p8 }
 0x147   : > { %v316_v21 = vadd.f32 %v314_v18, %v308_v16 }
 0x148   : > { %v326_v23 = vpop.permute.xlu1 %325  ;;  %v338_v26 = vpop.permute.xlu0 %337  ;;  %p1010_p1 = pnand %p1009_p10, %p1003_p7 }
 0x149   : > { %v343_v27 = vadd.f32 %v338_v26, %v329_v14  ;;  %v330_v19 = vadd.f32 %v326_v23, %v316_v21  ;;  %v458_v21 = vmul.f32 %v456_v7, %v1325_v60  ;;  %v492_v23 = vstv %s857_s23 }
 0x14a   : > { %v494_v37 = vmul.f32 %v492_v23, %v1336_v3 }
 0x14b   : > { %v351_v30 = vadd.f32 %v349_v29, %v343_v27 }
 0x14c   : > { %v340_v33 = vpop.permute.xlu1 %339  ;;  %v360_v24 = vpop.permute.xlu0 %359 }
 0x14d   : > { %v344_v34 = vadd.f32 %v340_v33, %v330_v19  ;;  %v365_v40 = vadd.f32 %v360_v24, %v351_v30  ;;  %v493_v30 = vmul.f32 %v492_v23, %v1329_v62 }
 0x14f   : > { %v352_v28 = vadd.f32 %v350_v35, %v344_v34 }
 0x150   : > { %v362_v41 = vpop.permute.xlu1 %361  ;;  %v374_v42 = vpop.permute.xlu0 %373 }
 0x151   : > { %v379_v45 = vadd.f32 %v374_v42, %v365_v40  ;;  %v366_v47 = vadd.f32 %v362_v41, %v352_v28  ;;  %v528_v40 = vstv %s860_s28 }
 0x153   : > { %v387_v50 = vadd.f32 %v385_v46, %v379_v45  ;;  %v529_v46 = vmul.f32 %v528_v40, %v1343_v8 }
 0x154   : > { %v376_v51 = vpop.permute.xlu1 %375  ;;  %v396_v32 = vpop.permute.xlu0 %395 }
 0x155   : > { %v380_v53 = vadd.f32 %v376_v51, %v366_v47  ;;  %v401_v58 = vadd.f32 %v396_v32, %v387_v50 }
 0x157   : > { %v388_v36 = vadd.f32 %v386_v55, %v380_v53  ;;  %v530_v53 = vmul.f32 %v528_v40, %v1349_v12  ;;  %v564_v55 = vstv %s863_s29 }
 0x158   : > { %v398_v59 = vpop.permute.xlu1 %397  ;;  %v410_v61 = vpop.permute.xlu0 %409 }
 0x159   : > { %v415_v63 = vadd.f32 %v410_v61, %v401_v58  ;;  %v402_v1 = vadd.f32 %v398_v59, %v388_v36  ;;  %v565_v61 = vmul.f32 %v564_v55, %v1355_v17 }
 0x15b   : > { %v423_v2 = vadd.f32 %v421_v0, %v415_v63 }
 0x15c   : > { %v412_v4 = vpop.permute.xlu1 %411  ;;  %v432_v38 = vpop.permute.xlu0 %431 }
 0x15d   : > { %v416_v5 = vadd.f32 %v412_v4, %v402_v1  ;;  %v437_v9 = vadd.f32 %v432_v38, %v423_v2  ;;  %v566_v4 = vmul.f32 %v564_v55, %v1361_v22  ;;  %v600_v38 = vstv %s866_s27 }
 0x15f   : > { %v424_v44 = vadd.f32 %v422_v6, %v416_v5 }
 0x160   : > { %v434_v10 = vpop.permute.xlu1 %433  ;;  %v446_v11 = vpop.permute.xlu0 %445 }
 0x161   : > { %v451_v13 = vadd.f32 %v446_v11, %v437_v9  ;;  %v438_v16 = vadd.f32 %v434_v10, %v424_v44  ;;  %v601_v44 = vmul.f32 %v600_v38, %v1365_v25 }
 0x163   : > { %v459_v18 = vadd.f32 %v457_v15, %v451_v13 }
 0x164   : > { %v448_v20 = vpop.permute.xlu1 %447  ;;  %v468_v48 = vpop.permute.xlu0 %467 }
 0x165   : > { %v452_v14 = vadd.f32 %v448_v20, %v438_v16  ;;  %v473_v26 = vadd.f32 %v468_v48, %v459_v18  ;;  %v602_v16 = vmul.f32 %v600_v38, %v1372_v31  ;;  %v636_v18 = vstv %s869_s24 }
 0x166   : > { %v637_v23 = vmul.f32 %v636_v18, %v1379_v39 }
 0x167   : > { %v460_v52 = vadd.f32 %v458_v21, %v452_v14 }
 0x168   : > { %v470_v27 = vpop.permute.xlu1 %469  ;;  %v482_v29 = vpop.permute.xlu0 %481 }
 0x169   : > { %v487_v19 = vadd.f32 %v482_v29, %v473_v26  ;;  %v474_v33 = vadd.f32 %v470_v27, %v460_v52 }
 0x16b   : > { %v495_v24 = vadd.f32 %v493_v30, %v487_v19  ;;  %v638_v19 = vmul.f32 %v636_v18, %v1385_v43  ;;  %v672_v30 = vstv %s872_s6  ;;  %v706_v43 = vstv %s705_s12 }
 0x16c   : > { %v484_v34 = vpop.permute.xlu1 %483  ;;  %v504_v56 = vpop.permute.xlu0 %503 }
 0x16d   : > { %v488_v35 = vadd.f32 %v484_v34, %v474_v33  ;;  %v509_v28 = vadd.f32 %v504_v56, %v495_v24 }
 0x16f   : > { %v496_v60 = vadd.f32 %v494_v37, %v488_v35  ;;  %v673_v35 = vmul.f32 %v672_v30, %v1391_v49 }
 0x170   : > { %v506_v41 = vpop.permute.xlu1 %505  ;;  %v518_v42 = vpop.permute.xlu0 %517 }
 0x171   : > { %v523_v45 = vadd.f32 %v518_v42, %v509_v28  ;;  %v510_v47 = vadd.f32 %v506_v41, %v496_v60  ;;  %v674_v41 = vmul.f32 %v672_v30, %v1397_v54 }
 0x173   : > { %v531_v50 = vadd.f32 %v529_v46, %v523_v45 }
 0x174   : > { %v520_v51 = vpop.permute.xlu1 %519  ;;  %v540_v62 = vpop.permute.xlu0 %539 }
 0x175   : > { %v524_v32 = vadd.f32 %v520_v51, %v510_v47  ;;  %v545_v57 = vadd.f32 %v540_v62, %v531_v50 }
 0x177   : > { %v532_v3 = vadd.f32 %v530_v53, %v524_v32 }
 0x178   : > { %v542_v58 = vpop.permute.xlu1 %541  ;;  %v554_v36 = vpop.permute.xlu0 %553 }
 0x179   : > { %v559_v59 = vadd.f32 %v554_v36, %v545_v57  ;;  %v546_v63 = vadd.f32 %v542_v58, %v532_v3 }
 0x17b   : > { %v567_v0 = vadd.f32 %v565_v61, %v559_v59 }
 0x17c   : > { %v556_v1 = vpop.permute.xlu1 %555  ;;  %v576_v8 = vpop.permute.xlu0 %575 }
 0x17d   : > { %v560_v2 = vadd.f32 %v556_v1, %v546_v63  ;;  %v581_v5 = vadd.f32 %v576_v8, %v567_v0 }
 0x17f   : > { %v568_v12 = vadd.f32 %v566_v4, %v560_v2 }
 0x180   : > { %v578_v6 = vpop.permute.xlu1 %577  ;;  %v590_v7 = vpop.permute.xlu0 %589 }
 0x181   : > { %v595_v9 = vadd.f32 %v590_v7, %v581_v5  ;;  %v582_v10 = vadd.f32 %v578_v6, %v568_v12 }
 0x183   : > { %v603_v11 = vadd.f32 %v601_v44, %v595_v9 }
 0x184   : > { %v592_v13 = vpop.permute.xlu1 %591  ;;  %v612_v17 = vpop.permute.xlu0 %611 }
 0x185   : > { %v596_v15 = vadd.f32 %v592_v13, %v582_v10  ;;  %v617_v20 = vadd.f32 %v612_v17, %v603_v11 }
 0x187   : > { %v604_v22 = vadd.f32 %v602_v16, %v596_v15 }
 0x188   : > { %v614_v48 = vpop.permute.xlu1 %613  ;;  %v626_v14 = vpop.permute.xlu0 %625 }
 0x189   : > { %v631_v21 = vadd.f32 %v626_v14, %v617_v20  ;;  %v618_v26 = vadd.f32 %v614_v48, %v604_v22 }
 0x18b   : > { %v639_v52 = vadd.f32 %v637_v23, %v631_v21 }
 0x18c   : > { %v628_v27 = vpop.permute.xlu1 %627  ;;  %v648_v25 = vpop.permute.xlu0 %647 }
 0x18d   : > { %v632_v29 = vadd.f32 %v628_v27, %v618_v26  ;;  %v653_v33 = vadd.f32 %v648_v25, %v639_v52 }
 0x18f   : > { %v640_v24 = vadd.f32 %v638_v19, %v632_v29 }
 0x190   : > { %v650_v31 = vpop.permute.xlu1 %649  ;;  %v662_v34 = vpop.permute.xlu0 %661 }
 0x191   : > { %v667_v56 = vadd.f32 %v662_v34, %v653_v33  ;;  %v654_v37 = vadd.f32 %v650_v31, %v640_v24 }
 0x193   : > { %v675_v40 = vadd.f32 %v673_v35, %v667_v56 }
 0x194   : > { %v664_v28 = vpop.permute.xlu1 %663  ;;  %v684_v39 = vpop.permute.xlu0 %683 }
 0x195   : > { %v668_v60 = vadd.f32 %v664_v28, %v654_v37  ;;  %v689_v42 = vadd.f32 %v684_v39, %v675_v40 }
 0x197   : > { %v676_v45 = vadd.f32 %v674_v41, %v668_v60 }
 0x198   : > { %v686_v46 = vpop.permute.xlu1 %685  ;;  %v698_v47 = vpop.permute.xlu0 %697 }
 0x199   : > { %v703_v50 = vadd.f32 %v698_v47, %v689_v42  ;;  %v690_v51 = vadd.f32 %v686_v46, %v676_v45 }
 0x19b   : > { %v707_v62 = vadd.f32 %v706_v43, %v703_v50 }
 0x19c   : > { %v700_v32 = vpop.permute.xlu1 %699 }
 0x19d   : > { %v875_v53 = vmul.f32 -1.442695, %v707_v62  ;;  %v704_v49 = vadd.f32 %v700_v32, %v690_v51 }
 0x19f   : > { %949 = vpow2.f32 %v875_v53  ;;  %v708_v55 = vadd.f32 %v706_v43, %v704_v49 }
 0x1a1   : > { %v876_v57 = vmul.f32 -1.442695, %v708_v55 }
 0x1a3   : > { %951 = vpow2.f32 %v876_v57 }
 0x1ac   : > { %v950_v3 = vpop.eup %949 }
 0x1ad   : > { %v715_v58 = vadd.f32 1.0, %v950_v3 }
 0x1af   : > { %953 = vrcp.f32 %v715_v58 }
 0x1b0   : > { %v952_v54 = vpop.eup %951 }
 0x1b1   : > { %v716_v36 = vadd.f32 1.0, %v952_v54 }
 0x1b3   : > { %955 = vrcp.f32 %v716_v36 }
 0x1bc   : > { %v954_v59 = vpop.eup %953 }
 0x1bd   : > { %722 = vst.msk [vmem:[%s203_s7] sm:$0xff] %vm721_vm3, %v954_v59 }
 0x1c0   : > { %v956_v61 = vpop.eup %955 }
 0x1c1   : > { %723 = vst.msk [vmem:[%s203_s7 + $0x8] sm:$0xff] %vm721_vm3, %v956_v61 }
 0x1c2   : > { %1013 = shalt.err (!%p1010_p1)
}
 0x1c3   : > { %s1014_s23 = scalar_lea.hbm %s1436_s10, 256  ;;  %s1018_s27 = scalar_lea.hbm %s1484_s3, 512 }
 0x1c4   : > { %p1015_p4 = scmp.ne.s32.totalorder %s1436_s10, %s1014_s23  ;;  %p1019_p6 = scmp.lt.s32.totalorder %s1436_s10, %s1484_s3 }
 0x1c5   : > { %p1020_p13 = scmp.lt.s32.totalorder %s1018_s27, %s1014_s23 }
 0x1c6   : > { %p1016_p11 = pnand %p1015_p4, %p1500_p0 }
 0x1c7   : > { %p1021_p3 = por %p1020_p13, %p1019_p6 }
 0x1c8   : > { %p1017_p5 = pneg %p1016_p11 }
 0x1ca   : > { %p1022_p12 = pnand %p1021_p3, %p1017_p5 }
 0x1cc   : > { %1025 = shalt.err (!%p1022_p12)
}
 0x1cd   : > { %s1079_s12 = smov 128   ;;  %s1080_s20 = smov 8  }
 0x1ce   : > { %890 = dma.vmem_to_hbm [thread:$0]  (%p1500_p0), %s1438_s5, 256, %s1436_s10, %s725_s11, %s1079_s12, %s1079_s12, %s1080_s20  }
 0x1cf PF: > { %s753_s30 = sand.u32 1, %s1056_s14   ;;  %p1501_p2 = scmp.ne.s32.totalorder %s1492_s26, 0 }
 0x1d0   : > { %p1502_p7 = scmp.ge.s32.totalorder %s1068_s17, 2  ;;  %s754_s7 = scalar_lea.sflag [#allocation6], %s753_s30 }
 0x1d2   : > { %p901_p8 = pnand %p1502_p7, %p1501_p2 }
 0x1d4   : > { %p902_p9 = pneg %p901_p8 }
 0x1d6   : > { %1051 = dma.done.wait (%p902_p9), %s754_s7, 256  }
 0x1d7   : > { %1053 = vsyncadd (%p902_p9), %s754_s7, 4294967040  ;;  %p18_p10 = scmp.ge.s32.totalorder %s1129_s19, 4   ;;  %s1503_s14 = smov %s1060_s15 }
 0x1d8   : > { %s1504_s15 = smov %s1064_s16  ;;  %s1505_s16 = smov %s1141_s22 }
 0x1d9   : > { %s1506_s17 = smov %s1129_s19  ;;  %20 = sbr.rel (!%p18_p10) target bundleno = 8 (0x8), region = 88 }
 0x1de   :  { %759 = vsyncpa [#allocation5], 1 }
 0x1df   :  { %761 = vsyncpa [#allocation5 + $0x1], 1 }
 0x1e0   :  { %762 = vsyncpa [#allocation6], 1 }
 0x1e1   :  { %764 = vsyncpa [#allocation6 + $0x1], 1 }
 0x1e2   :  { %765 = vsyncpa [#allocation7], 1 }
 0x1e3   :  { %767 = vsyncpa [#allocation7 + $0x1], 1 }

</bundles_post_ra>
